<compile_context>
chip_gen: v5e
topology: v5e:2x2
jax: 0.10.0
libtpu: 0.0.40
codegen_flags: <defaults>
</compile_context>

<pallas_src>
import jax
import jax.numpy as jnp
from jax import lax
from jax.experimental import pallas as pl
from jax.experimental.pallas import tpu as pltpu

_MIB = 1024 * 1024


def _round_up(v, m):
    return ((v + m - 1) // m) * m


def _vmem_capacity_bytes():
    try:
        return int(pltpu.get_tpu_info().vmem_capacity_bytes)
    except Exception:
        return 64 * _MIB  # conservative default (v7x per-core VMEM)


def _plan_tiles(c, s_total, itemsize, fuse_matmul, tile_bytes=None):
    """Pick x tiling so each grid step streams a multi-MiB, VMEM-padded tile."""
    pack = 8 * max(1, 4 // itemsize)           # sublane packing: f32->8, bf16->16, int8->32
    cap = _vmem_capacity_bytes()
    budget = (cap * 3) // 4                    # stay well below physical VMEM
    resident = 0
    if fuse_matmul:
        # f32 W (c,c) + b (1,c), padded to (8,128) tiles, x2 for pipeline buffers.
        resident = 2 * (_round_up(c, 8) * _round_up(c, 128) + 8 * _round_up(c, 128)) * 4
    default_target = 16 * _MIB if cap >= 96 * _MIB else 8 * _MIB
    max_tile = max(_MIB, (budget - resident - 6 * _MIB) // 2)
    target = min(tile_bytes if tile_bytes is not None else default_target, max_tile)

    # Dense layout (spatial on sublane x lane) whenever S is a multiple of 128 and
    # the minimum 8-row tile still fits the byte target; otherwise lane layout.
    use_2d = (s_total % 128 == 0) and (c * 8 * 128 * itemsize <= target)
    if use_2d:
        r_total = s_total // 128
        blk = max(8, (target // (c * 128 * itemsize)) // 8 * 8)
        if blk >= r_total:
            blk = r_total                      # full extent (allowed even if not %8)
        n_blocks = int(pl.cdiv(r_total, blk))
        tail = r_total - (n_blocks - 1) * blk
        padded_tile = c * _round_up(blk, 8) * 128 * itemsize
    else:
        c_pad = _round_up(c, pack)
        full_bytes = c_pad * _round_up(s_total, 128) * itemsize
        if full_bytes <= target:
            blk = s_total                      # single full-extent block
        else:
            blk = max(128, (target // (c_pad * itemsize)) // 128 * 128)
            if blk >= s_total:
                blk = s_total
        n_blocks = int(pl.cdiv(s_total, blk))
        tail = s_total - (n_blocks - 1) * blk
        padded_tile = c_pad * _round_up(blk, 128) * itemsize

    need = 2 * padded_tile + resident + 4 * _MIB
    vmem_limit = int(min(budget, max(32 * _MIB, need)))
    return dict(use_2d=use_2d, blk=int(blk), n_blocks=n_blocks, tail=int(tail),
                vmem_limit=vmem_limit)


def _make_kernel(*, spatial_2d, fuse_matmul, inv_hw, blk, tail):
    has_tail = tail != blk

    def kernel(*refs):
        if fuse_matmul:
            x_ref, w_ref, b_ref, o_ref, acc_ref = refs
        else:
            x_ref, o_ref, acc_ref = refs
        s = pl.program_id(1)

        @pl.when(s == 0)
        def _init():
            acc_ref[...] = jnp.zeros_like(acc_ref)

        x = x_ref[0].astype(jnp.float32)       # (C, blk, 128) or (C, blk)
        if has_tail:
            # Mask the (possibly OOB-padded) last tile; couple of VPU ops per vreg.
            limit = jnp.where(s == pl.num_programs(1) - 1, tail, blk)
            pos = lax.broadcasted_iota(jnp.int32, x.shape, 1)
            x = jnp.where(pos < limit, x, 0.0)

        if spatial_2d:
            p = jnp.sum(jnp.sum(x, axis=1), axis=-1, keepdims=True)   # (C, 1)
        else:
            p = jnp.sum(x, axis=-1, keepdims=True)                    # (C, 1)
        acc_ref[...] += p

        @pl.when(s == pl.num_programs(1) - 1)
        def _finalize():
            g = acc_ref[...] * inv_hw                                 # (C, 1) pooled mean
            if fuse_matmul:
                # out_row[j] = sum_i g[i] * W[i, j]   (VPU mul + sublane reduce)
                out = jnp.sum(w_ref[...] * g, axis=0, keepdims=True) + b_ref[...]
                o_ref[0] = out.astype(o_ref.dtype)                    # (1, C) lane-dense
            else:
                o_ref[0] = g.astype(o_ref.dtype)                      # (C, 1) pooled mean

    return kernel


def eem_pallas(x_nchw, params, *, tile_bytes=None, fuse_matmul=None):
    """Full EEM forward.

    x_nchw: (N, C, H, W)
    params: dict of nn.Conv2d(C, C, kernel_size=1) parameters:
      branch1: w11/b11 (conv1), w12/b12 (conv2)
      branch2: w21/b21 (conv1), w22/b22 (conv2)
      fusing conv: wc/bc
      weights: (C, C, 1, 1), biases: (C,)
    """
    n, c, h, w = x_nchw.shape
    s_total = h * w
    for name in ("w11", "w12", "w21", "w22", "wc"):
        assert params[name].shape[:2] == (c, c), name

    if fuse_matmul is None:
        fuse_matmul = c < 1024   # large C: keep W out of VMEM, do the GEMM in XLA

    # ---- algebraic fold (plain JAX, outside the kernel) --------------------
    # branch(g) = (g @ A.T + b1 + g) @ B.T + b2 = g @ (A.T + I) @ B.T + (b1 @ B.T + b2)
    def fold_branch(w1, b1, w2, b2):
        a = w1[:, :, 0, 0].astype(jnp.float32)
        bm = w2[:, :, 0, 0].astype(jnp.float32)
        w_eff = (a.T + jnp.eye(c, dtype=jnp.float32)) @ bm.T
        b_eff = b1.astype(jnp.float32) @ bm.T + b2.astype(jnp.float32)
        return w_eff, b_eff

    w1e, b1e = fold_branch(params["w11"], params["b11"], params["w12"], params["b12"])
    w2e, b2e = fold_branch(params["w21"], params["b21"], params["w22"], params["b22"])
    wc = params["wc"][:, :, 0, 0].astype(jnp.float32)
    bc = params["bc"].astype(jnp.float32)
    w_total = (w1e + w2e) @ wc.T                          # (C, C): out = g_row @ W + b
    b_total = ((b1e + b2e) @ wc.T + bc).reshape(1, c)     # (1, C)

    # ---- tiled, pipelined avg-pool + tiny epilogue --------------------------
    plan = _plan_tiles(c, s_total, x_nchw.dtype.itemsize, fuse_matmul, tile_bytes)
    blk, n_blocks, tail = plan["blk"], plan["n_blocks"], plan["tail"]

    kernel = _make_kernel(spatial_2d=plan["use_2d"], fuse_matmul=fuse_matmul,
                          inv_hw=float(1.0 / s_total), blk=blk, tail=tail)

    if plan["use_2d"]:
        x_view = x_nchw.reshape(n, c, s_total // 128, 128)
        x_spec = pl.BlockSpec((1, c, blk, 128), lambda i, s: (i, 0, s, 0))
    else:
        x_view = x_nchw.reshape(n, c, s_total)
        x_spec = pl.BlockSpec((1, c, blk), lambda i, s: (i, 0, s))

    compiler_params = pltpu.CompilerParams(
        dimension_semantics=("parallel", "arbitrary"),
        vmem_limit_bytes=plan["vmem_limit"],
    )
    scratch = [pltpu.VMEM((c, 1), jnp.float32)]

    if fuse_matmul:
        out = pl.pallas_call(
            kernel,
            out_shape=jax.ShapeDtypeStruct((n, 1, c), x_nchw.dtype),
            grid_spec=pltpu.PrefetchScalarGridSpec(
                num_scalar_prefetch=0,
                grid=(n, n_blocks),
                in_specs=[x_spec,
                          pl.BlockSpec((c, c), lambda i, s: (0, 0)),   # W_total resident
                          pl.BlockSpec((1, c), lambda i, s: (0, 0))],  # b_total resident
                out_specs=pl.BlockSpec((1, 1, c), lambda i, s: (i, 0, 0)),
                scratch_shapes=scratch),
            compiler_params=compiler_params,
        )(x_view, w_total, b_total)
        return out.reshape(n, c, 1, 1)

    # Large-C path: kernel emits pooled means; single XLA GEMM epilogue outside.
    means = pl.pallas_call(
        kernel,
        out_shape=jax.ShapeDtypeStruct((n, c, 1), jnp.float32),
        grid_spec=pltpu.PrefetchScalarGridSpec(
            num_scalar_prefetch=0,
            grid=(n, n_blocks),
            in_specs=[x_spec],
            out_specs=pl.BlockSpec((1, c, 1), lambda i, s: (i, 0, 0)),
            scratch_shapes=scratch),
        compiler_params=compiler_params,
    )(x_view)
    fused = means[:, :, 0] @ w_total + b_total
    return fused.astype(x_nchw.dtype).reshape(n, c, 1, 1)


def eem_ref(x_nchw, params):
    """Un-fused pure-JAX reference mirroring the PyTorch module."""
    g = jnp.mean(x_nchw, axis=(2, 3))                                # (N, C)

    def branch(gv, w1, b1, w2, b2):
        a = w1[:, :, 0, 0]
        bm = w2[:, :, 0, 0]
        wf = gv @ a.T + b1[None, :] + gv
        return wf @ bm.T + b2[None, :]

    o1 = branch(g, params["w11"], params["b11"], params["w12"], params["b12"])
    o2 = branch(g, params["w21"], params["b21"], params["w22"], params["b22"])
    fused = (o1 + o2) @ params["wc"][:, :, 0, 0].T + params["bc"][None, :]
    return fused[:, :, None, None]


if __name__ == "__main__":
    def make_params(c, key):
        keys = jax.random.split(key, 10)

        def conv(kw, kb):
            wgt = jax.random.normal(kw, (c, c, 1, 1), dtype=jnp.float32) * 0.1
            bias = jax.random.normal(kb, (c,), dtype=jnp.float32) * 0.1
            return wgt, bias

        w11, b11 = conv(keys[0], keys[1])
        w12, b12 = conv(keys[2], keys[3])
        w21, b21 = conv(keys[4], keys[5])
        w22, b22 = conv(keys[6], keys[7])
        wc, bc = conv(keys[8], keys[9])
        return dict(w11=w11, b11=b11, w12=w12, b12=b12,
                    w21=w21, b21=b21, w22=w22, b22=b22, wc=wc, bc=bc)

    def run_case(shape, tile_bytes=None):
        n, c, hh, ww = shape
        key = jax.random.PRNGKey(0)
        kx, kp = jax.random.split(key)
        x = jax.random.normal(kx, shape, dtype=jnp.float32)
        params = make_params(c, kp)
        out = jax.block_until_ready(eem_pallas(x, params, tile_bytes=tile_bytes))
        ref = eem_ref(x, params)
        assert out.shape == (n, c, 1, 1)
        err = float(jnp.max(jnp.abs(out - ref)))
        assert jnp.allclose(out, ref, atol=1e-4, rtol=1e-4), err

    # EEM(4, 4) at the module's natural small shape: dense 2-D spatial layout, 1 step.
    run_case((2, 4, 16, 16))
    # Tiny tile budget forces a multi-step spatial reduction with a masked last tile.
    run_case((2, 4, 48, 48), tile_bytes=16 * 1024)
    # H*W not a multiple of 128: lane-layout fallback with a masked last tile.
    run_case((2, 4, 20, 20), tile_bytes=8 * 1024)

    print("KERNEL_OK")
</pallas_src>

<mosaic_0001>
module attributes {stable_mosaic.version = 11 : i64} {
  func.func @kernel(%arg0: i32, %arg1: i32, %arg2: memref<1x4x2x128xf32, #tpu.memory_space<vmem>>, %arg3: memref<4x4xf32, #tpu.memory_space<vmem>>, %arg4: memref<1x4xf32, #tpu.memory_space<vmem>>, %arg5: memref<1x1x4xf32, #tpu.memory_space<vmem>>, %arg6: memref<4x1xf32, #tpu.memory_space<vmem>>) attributes {dimension_semantics = [#tpu.dimension_semantics<parallel>, #tpu.dimension_semantics<arbitrary>], iteration_bounds = array<i64: 2, 1>, scalar_prefetch = 0 : i64, scratch_operands = 1 : i64, tpu.core_type = #tpu.core_type<tc>, window_params = [{transform_indices = @transform_0, window_bounds = array<i64: 1, 4, 2, 128>}, {pipeline_mode = #tpu.pipeline_mode<synchronous>, transform_indices = @transform_1, window_bounds = array<i64: 4, 4>}, {pipeline_mode = #tpu.pipeline_mode<synchronous>, transform_indices = @transform_2, window_bounds = array<i64: 1, 4>}, {transform_indices = @transform_3, window_bounds = array<i64: 1, 1, 4>}]} {
    %c0_i32 = arith.constant 0 : i32
    %0 = arith.cmpi eq, %arg1, %c0_i32 : i32
    %1 = arith.extui %0 : i1 to i32
    %c0_i32_0 = arith.constant 0 : i32
    %2 = arith.cmpi ne, %1, %c0_i32_0 : i32
    scf.if %2 {
      %cst_11 = arith.constant 0.000000e+00 : f32
      %14 = vector.broadcast %cst_11 : f32 to vector<4x1xf32>
      %c0_12 = arith.constant 0 : index
      %c0_13 = arith.constant 0 : index
      %15 = vector.load %arg6[%c0_12, %c0_13] : memref<4x1xf32, #tpu.memory_space<vmem>>, vector<4x1xf32>
      tpu.vector_store %arg6[%c0_12, %c0_13], %14 {strides = array<i32>} : memref<4x1xf32, #tpu.memory_space<vmem>>, vector<4x1xf32>,
    } else {
    }
    %c0 = arith.constant 0 : index
    %c0_1 = arith.constant 0 : index
    %c0_2 = arith.constant 0 : index
    %c0_3 = arith.constant 0 : index
    %3 = vector.load %arg2[%c0, %c0_1, %c0_2, %c0_3] : memref<1x4x2x128xf32, #tpu.memory_space<vmem>>, vector<1x4x2x128xf32>
    %4 = vector.shape_cast %3 : vector<1x4x2x128xf32> to vector<4x2x128xf32>
    %cst = arith.constant dense<0.000000e+00> : vector<4x128xf32>
    %5 = vector.multi_reduction <add>, %4, %cst [1] : vector<4x2x128xf32> to vector<4x128xf32>
    %cst_4 = arith.constant dense<0.000000e+00> : vector<4xf32>
    %6 = vector.multi_reduction <add>, %5, %cst_4 [1] : vector<4x128xf32> to vector<4xf32>
    %7 = vector.shape_cast %6 : vector<4xf32> to vector<4x1xf32>
    %c0_5 = arith.constant 0 : index
    %c0_6 = arith.constant 0 : index
    %8 = vector.load %arg6[%c0_5, %c0_6] : memref<4x1xf32, #tpu.memory_space<vmem>>, vector<4x1xf32>
    %9 = arith.addf %8, %7 : vector<4x1xf32>
    %c0_7 = arith.constant 0 : index
    %c0_8 = arith.constant 0 : index
    %10 = vector.load %arg6[%c0_7, %c0_8] : memref<4x1xf32, #tpu.memory_space<vmem>>, vector<4x1xf32>
    tpu.vector_store %arg6[%c0_7, %c0_8], %9 {strides = array<i32>} : memref<4x1xf32, #tpu.memory_space<vmem>>, vector<4x1xf32>,
    %c0_i32_9 = arith.constant 0 : i32
    %11 = arith.cmpi eq, %arg1, %c0_i32_9 : i32
    %12 = arith.extui %11 : i1 to i32
    %c0_i32_10 = arith.constant 0 : i32
    %13 = arith.cmpi ne, %12, %c0_i32_10 : i32
    scf.if %13 {
      %c0_11 = arith.constant 0 : index
      %c0_12 = arith.constant 0 : index
      %14 = vector.load %arg6[%c0_11, %c0_12] : memref<4x1xf32, #tpu.memory_space<vmem>>, vector<4x1xf32>
      %cst_13 = arith.constant 3.906250e-03 : f32
      %15 = vector.broadcast %cst_13 : f32 to vector<4x1xf32>
      %16 = arith.mulf %14, %15 : vector<4x1xf32>
      %c0_14 = arith.constant 0 : index
      %c0_15 = arith.constant 0 : index
      %17 = vector.load %arg3[%c0_14, %c0_15] : memref<4x4xf32, #tpu.memory_space<vmem>>, vector<4x4xf32>
      %18 = vector.broadcast %16 : vector<4x1xf32> to vector<4x4xf32>
      %19 = arith.mulf %17, %18 : vector<4x4xf32>
      %cst_16 = arith.constant dense<0.000000e+00> : vector<4xf32>
      %20 = vector.multi_reduction <add>, %19, %cst_16 [0] : vector<4x4xf32> to vector<4xf32>
      %21 = vector.shape_cast %20 : vector<4xf32> to vector<1x4xf32>
      %c0_17 = arith.constant 0 : index
      %c0_18 = arith.constant 0 : index
      %22 = vector.load %arg4[%c0_17, %c0_18] : memref<1x4xf32, #tpu.memory_space<vmem>>, vector<1x4xf32>
      %23 = arith.addf %21, %22 : vector<1x4xf32>
      %c0_19 = arith.constant 0 : index
      %c0_20 = arith.constant 0 : index
      %c0_21 = arith.constant 0 : index
      %24 = vector.load %arg5[%c0_19, %c0_20, %c0_21] : memref<1x1x4xf32, #tpu.memory_space<vmem>>, vector<1x1x4xf32>
      %25 = vector.shape_cast %24 : vector<1x1x4xf32> to vector<1x4xf32>
      %26 = vector.shape_cast %23 : vector<1x4xf32> to vector<1x1x4xf32>
      tpu.vector_store %arg5[%c0_19, %c0_20, %c0_21], %26 {strides = array<i32>} : memref<1x1x4xf32, #tpu.memory_space<vmem>>, vector<1x1x4xf32>,
    } else {
    }
    return
  }
  func.func @transform_0(%arg0: i32, %arg1: i32) -> (i32, i32, i32, i32) {
    %c0_i32 = arith.constant 0 : i32
    %c0_i32_0 = arith.constant 0 : i32
    %c0_i32_1 = arith.constant 0 : i32
    return %arg0, %c0_i32, %arg1, %c0_i32_0 : i32, i32, i32, i32
  }
  func.func @transform_1(%arg0: i32, %arg1: i32) -> (i32, i32) {
    %c0_i32 = arith.constant 0 : i32
    %c0_i32_0 = arith.constant 0 : i32
    %c0_i32_1 = arith.constant 0 : i32
    return %c0_i32, %c0_i32_0 : i32, i32
  }
  func.func @transform_2(%arg0: i32, %arg1: i32) -> (i32, i32) {
    %c0_i32 = arith.constant 0 : i32
    %c0_i32_0 = arith.constant 0 : i32
    %c0_i32_1 = arith.constant 0 : i32
    return %c0_i32, %c0_i32_0 : i32, i32
  }
  func.func @transform_3(%arg0: i32, %arg1: i32) -> (i32, i32, i32) {
    %c0_i32 = arith.constant 0 : i32
    %c0_i32_0 = arith.constant 0 : i32
    %c0_i32_1 = arith.constant 0 : i32
    return %arg0, %c0_i32, %c0_i32_0 : i32, i32, i32
  }
}

</mosaic_0001>

<bundles_post_ra>
// kernel: tpu_custom_call.1
= control target key start
LH: loop header
LB: loop body
LE: loop exit
PB: predicated region body
PF: predicated region fallthrough
CT: control target
= control target key end

     0   :  { %s823_s0 = inlined_call_operand.hbm [shape: f32[2,4,2,128], index: 0, kind: input, shape index: {}]   ;;  %s824_s1 = inlined_call_operand.hbm [shape: f32[4,4], index: 1, kind: input, shape index: {}]   ;;  %s825_s2 = inlined_call_operand.vmem [shape: f32[1,4], index: 2, kind: input, shape index: {}]   ;;  %s826_s3 = inlined_call_operand.hbm [shape: f32[2,1,4], index: 3, kind: output, shape index: {}]  }
   0x1   :  { %827 = sst [smem:[#allocation12_spill]] %s824_s1 }
   0x2   :  { %8 = vsyncpa [#allocation4], 0 }
   0x3   :  { %10 = vsyncpa [#allocation4 + $0x1], 0 }
   0x4   :  { %11 = vsyncpa [#allocation7], 0 }
   0x5   :  { %12 = vsyncpa [#allocation5], 0 }
   0x6   :  { %14 = vsyncpa [#allocation5 + $0x1], 0  ;;  %s666_s12 = smov 0   ;;  %s668_s13 = smov 0  }
   0x7   :  { %s670_s14 = smov 0   ;;  %s672_s15 = smov 0  }
   0x8   :  { %s674_s16 = smov 0   ;;  %s676_s17 = smov 0  }
   0x9 LB: > { %s401_s18 = sadd.s32 4294967295, %s639_s17   ;;  %s402_s19 = sadd.s32 4294967294, %s639_s17   ;;  %s639_s17 = sphi %s676_s17, %s20_s17   ;;  %s635_s16 = sphi %s674_s16, %s840_s16   ;;  %s631_s15 = sphi %s672_s15, %s839_s15   ;;  %s627_s14 = sphi %s670_s14, %s838_s14   ;;  %s623_s13 = sphi %s668_s13, %s837_s13   ;;  %s619_s12 = sphi %s666_s12, %s836_s12  }
   0xa   : > { %s41_s20 = sadd.s32 1, %s627_s14  ;;  %p48_p0 = scmp.ne.s32.totalorder %s627_s14, %s623_s13 }
   0xb   : > { %p49_p1 = scmp.eq.s32.totalorder %s639_s17, 0  ;;  %p54_p2 = scmp.ne.s32.totalorder %s623_s13, %s619_s12 }
   0xc   : > { %p704_p3 = scmp.eq.s32.totalorder %s401_s18, 0  ;;  %p120_p4 = scmp.eq.s32.totalorder %s401_s18, 1 }
   0xd   : > { %p708_p5 = por %p49_p1, %p48_p0  ;;  %p126_p6 = scmp.eq.s32.totalorder %s402_s19, 1 }
   0xe   : > { %p714_p7 = por %p704_p3, %p54_p2  ;;  %p718_p8 = por %p120_p4, %p48_p0 }
   0xf   : > { %p722_p9 = por %p126_p6, %p54_p2  ;;  %p403_p10 = scmp.ge.s32.totalorder %s639_s17, 1 }
  0x10   : > { %p133_p11 = scmp.lt.s32.totalorder %s639_s17, 3  ;;  %s833_s1 = sld [smem:[#allocation12_spill]] }
  0x11   : > { %s641_s30 = smov [#allocation6]   ;;  %p405_p13 = scmp.ge.s32.totalorder %s639_s17, 2 }
  0x12   : > { %p731_p12 = pnand %p403_p10, %p133_p11  ;;  %s147_s4 = sshll.u32 %s641_s30, 4  ;;  %s148_s4 = int_to_ptr.vmem [resolvable:$true] %s147_s4 }
  0x13   : > { %p436_p1 = scmp.lt.s32.totalorder %s639_s17, 2  ;;  %s32_s6 = sadd.s32 1, %s635_s16 }
  0x14   : > { %p423_p0 = pneg %p731_p12  ;;  %p34_p6 = scmp.ge.s32.totalorder %s32_s6, 2 }
  0x15   : > { %p743_p4 = pnand %p436_p1, %p708_p5  ;;  %s161_s7 = sand.u32 1, %s627_s14  }
  0x16   : > { %s145_s28 = sshll.u32 %s833_s1, 4  ;;  %p424_p2 = pnand %p423_p0, %p704_p3  ;;  %s146_s28 = int_to_ptr.hbm [resolvable:$true] %s145_s28 }
  0x17   : > { %s842_s6 = smov (%p34_p6, %s32_s6), 0  ;;  %s406_s8 = sshll.u32 %s161_s7, 3 }
  0x18   : > { %426 = dma.hbm_to_vmem [thread:$0]  (!%p424_p2), %s146_s28, 64, %s148_s4, [#allocation7]  }
  0x19   : > { %s36_s9 = ssub.s32 %s635_s16, %s842_s6  ;;  %s414_s10 = sshll.u32 %s635_s16, 3 }
  0x1a   : > { %p39_p10 = scmp.eq.s32.totalorder %s36_s9, 0  ;;  %s171_s19 = scalar_lea.hbm %s823_s0, %s414_s10 }
  0x1b   : > { %s165_s22 = scalar_lea.vmem [#allocation3], %s406_s8  ;;  %s172_s30 = sshll.u32 %s171_s19, 4  ;;  %s173_s30 = int_to_ptr.hbm [resolvable:$true] %s172_s30 }
  0x1c   : > { %s174_s26 = sshll.u32 %s165_s22, 4  ;;  %s162_s28 = scalar_lea.sflag [#allocation4], %s161_s7  ;;  %s175_s26 = int_to_ptr.vmem [resolvable:$true] %s174_s26 }
  0x1d   : > { %s760_s27 = scalar_select %p39_p10, %s627_s14, %s41_s20  }
  0x1e   : > { %s642_s4 = smov 32   ;;  %s643_s1 = smov 2  }
  0x1f   : > { %430 = dma.hbm_to_vmem [thread:$0]  (!%p743_p4), %s173_s30, 128, %s175_s26, %s162_s28, %s642_s4, %s642_s4, %s643_s1  }
  0x20   : > { %186 = sbr.rel (%p731_p12) target bundleno = 322 (0x142), region = 32  ;;  %s767_s9 = sand.u32 (!%p731_p12), 1, %s623_s13  }
  0x21   : > { %s410_s8 = sshll.u32 (!%p731_p12), %s767_s9, 3  ;;  %s189_s20 = scalar_lea.sflag (!%p731_p12), [#allocation4], %s767_s9 }
  0x22   : > { %s192_s10 = scalar_lea.vmem (!%p731_p12), [#allocation3], %s410_s8 }
  0x25   : > { %606 = dma.done.wait (%p714_p7), %s189_s20, 128  }
  0x26   : > { %608 = vsyncadd (%p714_p7), %s189_s20, 4294967168 }
  0x27   : > { %610 = dma.done.wait (%p704_p3), [#allocation7], 64  }
  0x28   : > { %612 = vsyncadd (%p704_p3), [#allocation7], 4294967232  ;;  %vm224_vm0 = vcmask 3072   ;;  %v644_v0 = vmov 0.0   ;;  %vm230_vm1 = vcmask 1041408   ;;  %vm263_vm2 = vcmask 1041409   ;;  %s311_s23 = scalar_lea.hbm %s826_s3, %s631_s15 }
  0x29   : > { %225 = vst.msk [vmem:[#allocation2] sm:$0xf] %vm224_vm0, %v644_v0  ;;  %v226_v1 = vld [vmem:[%s192_s10] sm:$0x3]  ;;  %v227_v2 = vld [vmem:[%s192_s10 + $0x2] sm:$0x3] }
  0x2a   : > { %v228_v3 = vld [vmem:[%s192_s10 + $0x4] sm:$0x3]  ;;  %v229_v4 = vld [vmem:[%s192_s10 + $0x6] sm:$0x3]  ;;  %v231_v5 = vsel %vm230_vm1, %v226_v1, 0.0  ;;  %v238_v6 = vsel %vm230_vm1, %v227_v2, 0.0 }
  0x2b   : > { %v245_v7 = vsel %vm230_vm1, %v228_v3, 0.0  ;;  %v232_v8 = vrot.slane %v231_v5, 4  ;;  %v239_v9 = vrot.slane %v238_v6, 4  ;;  %v252_v11 = vsel %vm230_vm1, %v229_v4, 0.0  ;;  %v283_v43 = vld [vmem:[#allocation6] sm:$0xf] }
  0x2c   : > { %v246_v10 = vrot.slane %v245_v7, 4  ;;  %v253_v12 = vrot.slane %v252_v11, 4  ;;  %vm265_vm3 = vcmask 1042434   ;;  %vm267_vm4 = vcmask 1043459   ;;  %v298_v52 = vld [vmem:[%s825_s2] sm:$0x1] }
  0x2d   : > { %v233_v13 = vadd.f32 %v232_v8, %v231_v5  ;;  %v240_v14 = vadd.f32 %v239_v9, %v238_v6  ;;  %vm270_vm5 = vcmask 1043456   ;;  %v645_v37 = vmov 0   ;;  %s219_s7 = scalar_lea.vmem [#allocation8], %s767_s9  ;;  %s315_s18 = sshll.u32 %s311_s23, 4  ;;  %s316_s18 = int_to_ptr.hbm [resolvable:$true] %s315_s18 }
  0x2e   : > { %v247_v15 = vadd.f32 %v246_v10, %v245_v7  ;;  %v254_v16 = vadd.f32 %v253_v12, %v252_v11  ;;  %492 = vset.pattern.permute.xlu0 %v645_v37  ;;  %vm290_vm6 = vcmask 27648   ;;  %s313_s11 = sshll.u32 %s219_s7, 4  ;;  %vm300_vm7 = vcmask 24576   ;;  %s303_s19 = scalar_lea.sflag [#allocation5], %s767_s9  ;;  %s314_s11 = int_to_ptr.vmem [resolvable:$true] %s313_s11 }
  0x2f   : > { %v234_v17 = vrot.slane %v233_v13, 2  ;;  %v241_v18 = vrot.slane %v240_v14, 2  ;;  %s567_s22 = sshra.s32 %s316_s18, 4  ;;  %s573_s28 = scalar_lea.hbm %s826_s3, 2  ;;  %s568_s22 = int_to_ptr.hbm [resolvable:$true] %s567_s22 }
  0x30   : > { %v248_v19 = vrot.slane %v247_v15, 2  ;;  %v255_v20 = vrot.slane %v254_v16, 2  ;;  %v274_v38 = vld [vmem:[#allocation2] sm:$0xf]  ;;  %s569_s26 = scalar_lea.hbm %s568_s22, 1  ;;  %p574_p11 = scmp.lt.s32.totalorder %s568_s22, %s826_s3 }
  0x31   : > { %v235_v21 = vadd.f32 %v234_v17, %v233_v13  ;;  %v242_v22 = vadd.f32 %v241_v18, %v240_v14  ;;  %p570_p3 = scmp.ne.s32.totalorder %s568_s22, %s569_s26  ;;  %p575_p12 = scmp.lt.s32.totalorder %s573_s28, %s569_s26 }
  0x32   : > { %v249_v23 = vadd.f32 %v248_v19, %v247_v15  ;;  %v256_v24 = vadd.f32 %v255_v20, %v254_v16 }
  0x33   : > { %v236_v25 = vrot.slane %v235_v21, 1  ;;  %v243_v26 = vrot.slane %v242_v22, 1  ;;  %p571_p5 = pnand %p570_p3, %p718_p8  ;;  %p576_p0 = por %p575_p12, %p574_p11 }
  0x34   : > { %v250_v27 = vrot.slane %v249_v23, 1  ;;  %v257_v28 = vrot.slane %v256_v24, 1 }
  0x35   : > { %v237_v29 = vadd.f32 %v236_v25, %v235_v21  ;;  %v244_v30 = vadd.f32 %v243_v26, %v242_v22  ;;  %p572_p7 = pneg %p571_p5 }
  0x36   : > { %v251_v31 = vadd.f32 %v250_v27, %v249_v23  ;;  %v258_v32 = vadd.f32 %v257_v28, %v256_v24 }
  0x37   : > { %v264_v33 = vsel %vm263_vm2, %v244_v30, %v237_v29  ;;  %p577_p1 = pnand %p576_p0, %p572_p7 }
  0x38   : > { %v266_v34 = vsel %vm265_vm3, %v251_v31, %v264_v33 }
  0x39   : > { %v268_v35 = vsel %vm267_vm4, %v258_v32, %v266_v34 }
  0x3a   : > { %v271_v36 = vsel %vm270_vm5, %v268_v35, 0.0 }
  0x3b   : > { %272 = vadd.xlane.f32.xlu0 %v271_v36 }
  0xae   : > { %v273_v39 = vpop.xlane.xlu0 %272 }
  0xaf   : > { %v275_v40 = vadd.f32 %v274_v38, %v273_v39 }
  0xb1   : > { %277 = vst.msk [vmem:[#allocation2] sm:$0xf] %vm224_vm0, %v275_v40 }
  0xb8   : > { %v281_v41 = vld [vmem:[#allocation2] sm:$0xf] }
  0xb9   : > { %v282_v42 = vmul.f32 0.00390625, %v281_v41 }
  0xbb   : > { %286 = vperm.xlu0 %492, %v282_v42  }
 0x12d   : > { %v287_v44 = vpop.permute.xlu0 %286 }
 0x12e   : > { %v289_v45 = vmul.f32 %v287_v44, %v283_v43 }
 0x130   : > { %v291_v46 = vsel %vm290_vm6, %v289_v45, 0.0 }
 0x131   : > { %v292_v47 = vrot.slane %v291_v46, 4 }
 0x133   : > { %v293_v48 = vadd.f32 %v292_v47, %v291_v46 }
 0x135   : > { %v294_v49 = vrot.slane %v293_v48, 2 }
 0x137   : > { %v295_v50 = vadd.f32 %v294_v49, %v293_v48 }
 0x139   : > { %v296_v51 = vrot.slane %v295_v50, 1 }
 0x13b   : > { %v297_v53 = vadd.f32 %v296_v51, %v295_v50 }
 0x13d   : > { %v299_v54 = vadd.f32 %v298_v52, %v297_v53 }
 0x13f   : > { %301 = vst.msk [vmem:[%s219_s7] sm:$0x1] %vm300_vm7, %v299_v54 }
 0x140   : > { %580 = shalt.err (!%p577_p1)
}
 0x141   : > { %421 = dma.vmem_to_hbm [thread:$0]  (%p718_p8), %s314_s11, 16, %s316_s18, %s303_s19  }
 0x142 PF: > { %s327_s9 = sand.u32 1, %s619_s12   ;;  %p432_p2 = pnand %p405_p13, %p722_p9 }
 0x143   : > { %s328_s20 = scalar_lea.sflag [#allocation5], %s327_s9 }
 0x144   : > { %p433_p4 = pneg %p432_p2 }
 0x146   : > { %614 = dma.done.wait (%p433_p4), %s328_s20, 16  }
 0x147   : > { %616 = vsyncadd (%p433_p4), %s328_s20, 4294967280  ;;  %s20_s17 = sadd.s32 1, %s639_s17   ;;  %s836_s12 = smov %s623_s13 }
 0x148   : > { %p17_p6 = scmp.ge.s32.totalorder %s20_s17, 4   ;;  %s837_s13 = smov %s627_s14 }
 0x149   : > { %s838_s14 = smov %s760_s27  ;;  %s839_s15 = smov %s635_s16 }
 0x14a   : > { %s840_s16 = smov %s842_s6  ;;  %19 = sbr.rel (!%p17_p6) target bundleno = 9 (0x9), region = 89 }
 0x14f   :  { %333 = vsyncpa [#allocation4], 1 }
 0x150   :  { %335 = vsyncpa [#allocation4 + $0x1], 1 }
 0x151   :  { %336 = vsyncpa [#allocation7], 1 }
 0x152   :  { %337 = vsyncpa [#allocation5], 1 }
 0x153   :  { %339 = vsyncpa [#allocation5 + $0x1], 1 }

</bundles_post_ra>
